<compile_context>
chip_gen: v5e
topology: v5e:2x2
jax: 0.10.0
libtpu: 0.0.40
codegen_flags: <defaults>
</compile_context>

<pallas_src>
import jax
import jax.numpy as jnp
from jax import lax
from jax.experimental import pallas as pl
from jax.experimental.pallas import tpu as pltpu


_INV_SQRT2 = 0.7071067811865476
_MIB = 1024 * 1024


def _round_up(x, m):
    return (x + m - 1) // m * m


def _cdiv(a, b):
    return (a + b - 1) // b


# ---------------------------------------------------------------------------
# Kernels
# ---------------------------------------------------------------------------

def _geglu_act(x, w1h, w1g, b1h, b1g):
    # Two matmuls on pre-split W1 (MXU, bf16 in / f32 accumulate).
    hidden = jnp.dot(x, w1h, preferred_element_type=jnp.float32) + b1h
    gate = jnp.dot(x, w1g, preferred_element_type=jnp.float32) + b1g
    # Exact (erf) GELU in f32 — matches torch.nn.functional.gelu default.
    gelu_gate = 0.5 * gate * (1.0 + lax.erf(gate * _INV_SQRT2))
    # Dropout(p=0.0) == identity -> nothing to do.
    return hidden * gelu_gate


def _ffn_resident_kernel(x_ref, w1h_ref, w1g_ref, b1h_ref, b1g_ref,
                         w2_ref, b2_ref, o_ref):
    # Grid: (row tiles,). Weights have constant index_maps, so they are DMA'd
    # from HBM exactly once per call and stay VMEM-resident across row tiles.
    act = _geglu_act(x_ref[...], w1h_ref[...], w1g_ref[...],
                     b1h_ref[...], b1g_ref[...])
    o_ref[...] = (jnp.dot(act.astype(w2_ref.dtype), w2_ref[...],
                          preferred_element_type=jnp.float32)
                  + b2_ref[...]).astype(o_ref.dtype)


def _ffn_streamed_kernel(x_ref, w1h_ref, w1g_ref, b1h_ref, b1g_ref,
                         w2_ref, b2_ref, o_ref, acc_ref):
    # Grid: (row tiles [parallel], inner-dim tiles [arbitrary / reduction]).
    # x_ref:   (tm, dim)        bf16 (resident across the inner axis)
    # w1h/w1g: (dim, tk)        bf16 tiles of the pre-split GEGLU projection
    # b1h/b1g: (1, tk)          f32
    # w2_ref:  (tk, dim_out)    bf16
    # b2_ref:  (1, dim_out)     f32
    # acc_ref: (tm, dim_out)    f32 scratch accumulator
    k = pl.program_id(1)
    nk = pl.num_programs(1)

    act = _geglu_act(x_ref[...], w1h_ref[...], w1g_ref[...],
                     b1h_ref[...], b1g_ref[...])
    contrib = jnp.dot(act.astype(w2_ref.dtype), w2_ref[...],
                      preferred_element_type=jnp.float32)

    # Set-then-add instead of zero-init + '+=': saves one full (tm, dim_out)
    # f32 store and read per row tile (most relevant on v5e's single vst slot).
    @pl.when(k == 0)
    def _():
        acc_ref[...] = contrib

    @pl.when(k > 0)
    def _():
        acc_ref[...] += contrib

    @pl.when(k == nk - 1)
    def _():
        o_ref[...] = (acc_ref[...] + b2_ref[...]).astype(o_ref.dtype)


# ---------------------------------------------------------------------------
# Tile / chip selection
# ---------------------------------------------------------------------------

def _chip_config():
    kind = ""
    try:
        kind = jax.devices()[0].device_kind.lower()
    except Exception:
        pass
    try:
        vmem_cap = getattr(pltpu.get_tpu_info(), "vmem_capacity_bytes", None)
    except Exception:
        vmem_cap = None

    if "v6" in kind:
        # v6e: 128 MiB VMEM, ~1.4 TB/s HBM, 918 TF/s -> roofline tm ~ 680.
        cfg = dict(tm=1024, tk_cap=1024, vmem_limit=100 * _MIB, two_cores=False)
    elif "v5" in kind:
        # v5e: 128 MiB VMEM, ~0.82 TB/s HBM, 197 TF/s -> roofline tm ~ 240.
        cfg = dict(tm=512, tk_cap=1024, vmem_limit=96 * _MIB, two_cores=False)
    else:
        # v7x / unknown: assume 64 MiB VMEM per TensorCore, 2 TCs per chip.
        cfg = dict(tm=512, tk_cap=512, vmem_limit=56 * _MIB, two_cores=True)

    if vmem_cap is not None:
        cfg["vmem_limit"] = min(cfg["vmem_limit"],
                                max(vmem_cap - 8 * _MIB, 16 * _MIB))
    return cfg


def _pick_row_tile(M, tm_target, two_cores):
    tm = max(8, min(_round_up(tm_target, 8), _round_up(M, 8)))
    if two_cores:
        # Prefer an even number of row tiles so megacore sharding of the
        # "parallel" row axis keeps both TensorCores busy.
        n = _cdiv(M, tm)
        if n > 1 and n % 2 == 1:
            tm = max(8, _round_up(_cdiv(M, n + 1), 8))
    return tm


def _pick_inner_tile(inner, cap):
    for cand in (1024, 512, 256, 128):
        if cand <= cap and inner % cand == 0:
            return cand
    return inner


def _resident_vmem_bytes(tm, dim, inner, dim_out, out_itemsize):
    # Weights double-buffered by the default pipeline (fetched once, but x2
    # allocation); see TODO(synk) about pl.Buffered(1).
    w = 2 * (2 * dim * inner + inner * dim_out) * 2
    b = 2 * (2 * inner + dim_out) * 4
    x = 2 * tm * dim * 2
    out = 2 * tm * dim_out * out_itemsize
    return w + b + x + out


def _streamed_vmem_bytes(tm, tk, dim, dim_out, out_itemsize):
    x = 2 * tm * dim * 2
    w1 = 2 * 2 * dim * tk * 2
    w2 = 2 * tk * dim_out * 2
    b = 2 * (2 * tk + dim_out) * 4
    out = 2 * tm * dim_out * out_itemsize
    acc = tm * dim_out * 4
    return x + w1 + w2 + b + out + acc


# ---------------------------------------------------------------------------
# Public API
# ---------------------------------------------------------------------------

def prepare_feed_forward_params(w1, b1, w2, b2, compute_dtype=jnp.bfloat16):
    """Pre-split W1 into hidden/gate halves and pre-cast to the MXU dtype.

    Call ONCE at model-load time (hoisted out of the per-call path) so each
    forward does not pay a full HBM read+write of the weights for the cast.

    w1: (dim, 2*inner_dim), b1: (2*inner_dim,)   -- GEGLU projection
    w2: (inner_dim, dim_out), b2: (dim_out,)     -- output Linear
    """
    inner = w1.shape[1] // 2
    dim_out = w2.shape[1]
    return dict(
        w1h=jnp.asarray(w1[:, :inner], dtype=compute_dtype),
        w1g=jnp.asarray(w1[:, inner:], dtype=compute_dtype),
        b1h=jnp.asarray(b1[:inner], dtype=jnp.float32).reshape(1, inner),
        b1g=jnp.asarray(b1[inner:], dtype=jnp.float32).reshape(1, inner),
        w2=jnp.asarray(w2, dtype=compute_dtype),
        b2=jnp.asarray(b2, dtype=jnp.float32).reshape(1, dim_out),
    )


def feed_forward(hidden_states, params, *, force_streamed=False):
    """hidden_states: (B, S, dim) -> (B, S, dim_out).

    `params` comes from prepare_feed_forward_params (pre-split, pre-cast).
    """
    orig_dtype = hidden_states.dtype
    B, S, dim = hidden_states.shape
    w1h, w1g = params["w1h"], params["w1g"]
    b1h, b1g = params["b1h"], params["b1g"]
    w2, b2 = params["w2"], params["b2"]
    inner = w1h.shape[1]
    dim_out = w2.shape[1]
    compute_dtype = w1h.dtype
    M = B * S
    out_itemsize = jnp.dtype(orig_dtype).itemsize

    cfg = _chip_config()
    budget = cfg["vmem_limit"] - 4 * _MIB

    tm = _pick_row_tile(M, cfg["tm"], cfg["two_cores"])

    use_resident = (not force_streamed and
                    _resident_vmem_bytes(tm, dim, inner, dim_out,
                                         out_itemsize) <= budget)

    if not use_resident:
        tk = _pick_inner_tile(inner, cfg["tk_cap"])
        # Shrink tiles until the double-buffered working set fits VMEM.
        while _streamed_vmem_bytes(tm, tk, dim, dim_out, out_itemsize) > budget:
            if tk > 128 and tk % 256 == 0 and inner % (tk // 2) == 0:
                tk //= 2
            elif tm > 128:
                tm = max(128, _round_up(tm // 2, 8))
            else:
                break
        tm = max(8, min(tm, _round_up(M, 8)))

    # Row padding so any (B, S) works — garbage rows are sliced off at the end.
    x2d = hidden_states.reshape(M, dim).astype(compute_dtype)
    m_pad = _round_up(M, tm)
    if m_pad != M:
        x2d = jnp.pad(x2d, ((0, m_pad - M), (0, 0)))
    n_row = m_pad // tm

    weight_bytes = ((2 * dim * inner + inner * dim_out)
                    * jnp.dtype(compute_dtype).itemsize)
    act_bytes = m_pad * dim * 2 + m_pad * dim_out * out_itemsize
    flops = 2 * m_pad * dim * (2 * inner) + 2 * m_pad * inner * dim_out

    if use_resident:
        cost = pl.CostEstimate(flops=flops, transcendentals=m_pad * inner,
                               bytes_accessed=weight_bytes + act_bytes)
        out2d = pl.pallas_call(
            _ffn_resident_kernel,
            out_shape=jax.ShapeDtypeStruct((m_pad, dim_out), orig_dtype),
            grid_spec=pltpu.PrefetchScalarGridSpec(
                num_scalar_prefetch=0,
                grid=(n_row,),
                in_specs=[
                    pl.BlockSpec((tm, dim), lambda i: (i, 0)),        # x
                    pl.BlockSpec((dim, inner), lambda i: (0, 0)),     # W1 hidden
                    pl.BlockSpec((dim, inner), lambda i: (0, 0)),     # W1 gate
                    pl.BlockSpec((1, inner), lambda i: (0, 0)),       # b1 hidden
                    pl.BlockSpec((1, inner), lambda i: (0, 0)),       # b1 gate
                    pl.BlockSpec((inner, dim_out), lambda i: (0, 0)),  # W2
                    pl.BlockSpec((1, dim_out), lambda i: (0, 0)),      # b2
                ],
                out_specs=pl.BlockSpec((tm, dim_out), lambda i: (i, 0)),
            ),
            compiler_params=pltpu.CompilerParams(
                dimension_semantics=("parallel",),
                vmem_limit_bytes=cfg["vmem_limit"],
            ),
            cost_estimate=cost,
        )(x2d, w1h, w1g, b1h, b1g, w2, b2)
    else:
        cost = pl.CostEstimate(flops=flops, transcendentals=m_pad * inner,
                               bytes_accessed=weight_bytes * n_row + act_bytes)
        grid = (n_row, max(1, inner // tk))
        out2d = pl.pallas_call(
            _ffn_streamed_kernel,
            out_shape=jax.ShapeDtypeStruct((m_pad, dim_out), orig_dtype),
            grid_spec=pltpu.PrefetchScalarGridSpec(
                num_scalar_prefetch=0,
                grid=grid,
                in_specs=[
                    pl.BlockSpec((tm, dim), lambda i, k: (i, 0)),        # x (resident over k)
                    pl.BlockSpec((dim, tk), lambda i, k: (0, k)),        # W1 hidden tile
                    pl.BlockSpec((dim, tk), lambda i, k: (0, k)),        # W1 gate tile
                    pl.BlockSpec((1, tk), lambda i, k: (0, k)),          # b1 hidden tile
                    pl.BlockSpec((1, tk), lambda i, k: (0, k)),          # b1 gate tile
                    pl.BlockSpec((tk, dim_out), lambda i, k: (k, 0)),    # W2 tile
                    pl.BlockSpec((1, dim_out), lambda i, k: (0, 0)),     # b2
                ],
                out_specs=pl.BlockSpec((tm, dim_out), lambda i, k: (i, 0)),
                scratch_shapes=[pltpu.VMEM((tm, dim_out), jnp.float32)],
            ),
            compiler_params=pltpu.CompilerParams(
                dimension_semantics=("parallel", "arbitrary"),
                vmem_limit_bytes=cfg["vmem_limit"],
            ),
            cost_estimate=cost,
        )(x2d, w1h, w1g, b1h, b1g, w2, b2)

    return out2d[:M].reshape(B, S, dim_out)


# ---------------------------------------------------------------------------
# Reference (same numerics: bf16 matmul operands, f32 accumulate, erf GELU)
# ---------------------------------------------------------------------------

def _reference(hidden_states, w1, b1, w2, b2, compute_dtype=jnp.bfloat16):
    B, S, dim = hidden_states.shape
    x = hidden_states.reshape(B * S, dim).astype(compute_dtype)
    proj = jnp.dot(x, w1.astype(compute_dtype),
                   preferred_element_type=jnp.float32) + b1.astype(jnp.float32)
    inner = proj.shape[-1] // 2
    h, g = proj[:, :inner], proj[:, inner:]
    act = h * (0.5 * g * (1.0 + lax.erf(g * _INV_SQRT2)))
    out = jnp.dot(act.astype(compute_dtype), w2.astype(compute_dtype),
                  preferred_element_type=jnp.float32) + b2.astype(jnp.float32)
    return out.astype(hidden_states.dtype).reshape(B, S, -1)


if __name__ == "__main__":
    # Module config: dim=32, mult=4 -> inner_dim=128, dim_out=dim=32.
    B, S, dim = 2, 8, 32
    mult = 4
    inner_dim = dim * mult
    dim_out = dim

    key = jax.random.PRNGKey(0)
    kx, k1, kb1, k2, kb2 = jax.random.split(key, 5)

    x = jax.random.normal(kx, (B, S, dim), dtype=jnp.float32)
    # GEGLU.proj : Linear(dim, 2*inner_dim)  (weights stored (in, out) here)
    w1 = jax.random.normal(k1, (dim, 2 * inner_dim), dtype=jnp.float32) * 0.05
    b1 = jax.random.normal(kb1, (2 * inner_dim,), dtype=jnp.float32) * 0.05
    # net[2] : Linear(inner_dim, dim_out)
    w2 = jax.random.normal(k2, (inner_dim, dim_out), dtype=jnp.float32) * 0.05
    b2 = jax.random.normal(kb2, (dim_out,), dtype=jnp.float32) * 0.05

    # Weight prep is hoisted out of the per-call path (done once at load).
    params = prepare_feed_forward_params(w1, b1, w2, b2)

    # Exercise both kernel variants (resident weights + streamed reduction).
    out_res = jax.block_until_ready(feed_forward(x, params))
    out_str = jax.block_until_ready(feed_forward(x, params,
                                                 force_streamed=True))

    ref = _reference(x, w1, b1, w2, b2)
    assert out_res.shape == (B, S, dim_out)
    assert out_str.shape == (B, S, dim_out)
    assert jnp.allclose(out_res, ref, atol=5e-3, rtol=5e-3), (
        float(jnp.max(jnp.abs(out_res - ref))))
    assert jnp.allclose(out_str, ref, atol=5e-3, rtol=5e-3), (
        float(jnp.max(jnp.abs(out_str - ref))))

    print("KERNEL_OK")
</pallas_src>

<mosaic_0001>
module attributes {stable_mosaic.version = 11 : i64} {
  func.func @_ffn_resident_kernel(%arg0: i32, %arg1: memref<16x32xbf16, #tpu.memory_space<vmem>>, %arg2: memref<32x128xbf16, #tpu.memory_space<vmem>>, %arg3: memref<32x128xbf16, #tpu.memory_space<vmem>>, %arg4: memref<1x128xf32, #tpu.memory_space<vmem>>, %arg5: memref<1x128xf32, #tpu.memory_space<vmem>>, %arg6: memref<128x32xbf16, #tpu.memory_space<vmem>>, %arg7: memref<1x32xf32, #tpu.memory_space<vmem>>, %arg8: memref<16x32xf32, #tpu.memory_space<vmem>>) attributes {dimension_semantics = [#tpu.dimension_semantics<parallel>], iteration_bounds = array<i64: 1>, scalar_prefetch = 0 : i64, scratch_operands = 0 : i64, tpu.core_type = #tpu.core_type<tc>, window_params = [{transform_indices = @transform_0, window_bounds = array<i64: 16, 32>}, {pipeline_mode = #tpu.pipeline_mode<synchronous>, transform_indices = @transform_1, window_bounds = array<i64: 32, 128>}, {pipeline_mode = #tpu.pipeline_mode<synchronous>, transform_indices = @transform_2, window_bounds = array<i64: 32, 128>}, {pipeline_mode = #tpu.pipeline_mode<synchronous>, transform_indices = @transform_3, window_bounds = array<i64: 1, 128>}, {pipeline_mode = #tpu.pipeline_mode<synchronous>, transform_indices = @transform_4, window_bounds = array<i64: 1, 128>}, {pipeline_mode = #tpu.pipeline_mode<synchronous>, transform_indices = @transform_5, window_bounds = array<i64: 128, 32>}, {pipeline_mode = #tpu.pipeline_mode<synchronous>, transform_indices = @transform_6, window_bounds = array<i64: 1, 32>}, {transform_indices = @transform_7, window_bounds = array<i64: 16, 32>}]} {
    %c0 = arith.constant 0 : index
    %c0_0 = arith.constant 0 : index
    %0 = vector.load %arg1[%c0, %c0_0] : memref<16x32xbf16, #tpu.memory_space<vmem>>, vector<16x32xbf16>
    %c0_1 = arith.constant 0 : index
    %c0_2 = arith.constant 0 : index
    %1 = vector.load %arg2[%c0_1, %c0_2] : memref<32x128xbf16, #tpu.memory_space<vmem>>, vector<32x128xbf16>
    %c0_3 = arith.constant 0 : index
    %c0_4 = arith.constant 0 : index
    %2 = vector.load %arg3[%c0_3, %c0_4] : memref<32x128xbf16, #tpu.memory_space<vmem>>, vector<32x128xbf16>
    %c0_5 = arith.constant 0 : index
    %c0_6 = arith.constant 0 : index
    %3 = vector.load %arg4[%c0_5, %c0_6] : memref<1x128xf32, #tpu.memory_space<vmem>>, vector<1x128xf32>
    %c0_7 = arith.constant 0 : index
    %c0_8 = arith.constant 0 : index
    %4 = vector.load %arg5[%c0_7, %c0_8] : memref<1x128xf32, #tpu.memory_space<vmem>>, vector<1x128xf32>
    %cst = arith.constant dense<0.000000e+00> : vector<16x128xf32>
    %5 = tpu.matmul %0, %1, %cst {dimension_numbers = #tpu.dot_dimension_numbers<[1], [0], [0], [1], [0, 0, 1, 1], [], []>} : vector<16x32xbf16>, vector<32x128xbf16>, vector<16x128xf32> -> vector<16x128xf32>
    %6 = vector.broadcast %3 : vector<1x128xf32> to vector<16x128xf32>
    %7 = arith.addf %5, %6 : vector<16x128xf32>
    %cst_9 = arith.constant dense<0.000000e+00> : vector<16x128xf32>
    %8 = tpu.matmul %0, %2, %cst_9 {dimension_numbers = #tpu.dot_dimension_numbers<[1], [0], [0], [1], [0, 0, 1, 1], [], []>} : vector<16x32xbf16>, vector<32x128xbf16>, vector<16x128xf32> -> vector<16x128xf32>
    %9 = vector.broadcast %4 : vector<1x128xf32> to vector<16x128xf32>
    %10 = arith.addf %8, %9 : vector<16x128xf32>
    %cst_10 = arith.constant 5.000000e-01 : f32
    %11 = vector.broadcast %cst_10 : f32 to vector<16x128xf32>
    %12 = arith.mulf %11, %10 : vector<16x128xf32>
    %cst_11 = arith.constant 0.707106769 : f32
    %13 = vector.broadcast %cst_11 : f32 to vector<16x128xf32>
    %14 = arith.mulf %10, %13 : vector<16x128xf32>
    %15 = math.erf %14 : vector<16x128xf32>
    %cst_12 = arith.constant 1.000000e+00 : f32
    %16 = vector.broadcast %cst_12 : f32 to vector<16x128xf32>
    %17 = arith.addf %16, %15 : vector<16x128xf32>
    %18 = arith.mulf %12, %17 : vector<16x128xf32>
    %19 = arith.mulf %7, %18 : vector<16x128xf32>
    %20 = arith.truncf %19 : vector<16x128xf32> to vector<16x128xbf16>
    %c0_13 = arith.constant 0 : index
    %c0_14 = arith.constant 0 : index
    %21 = vector.load %arg6[%c0_13, %c0_14] : memref<128x32xbf16, #tpu.memory_space<vmem>>, vector<128x32xbf16>
    %cst_15 = arith.constant dense<0.000000e+00> : vector<16x32xf32>
    %22 = tpu.matmul %20, %21, %cst_15 {dimension_numbers = #tpu.dot_dimension_numbers<[1], [0], [0], [1], [0, 0, 1, 1], [], []>} : vector<16x128xbf16>, vector<128x32xbf16>, vector<16x32xf32> -> vector<16x32xf32>
    %c0_16 = arith.constant 0 : index
    %c0_17 = arith.constant 0 : index
    %23 = vector.load %arg7[%c0_16, %c0_17] : memref<1x32xf32, #tpu.memory_space<vmem>>, vector<1x32xf32>
    %24 = vector.broadcast %23 : vector<1x32xf32> to vector<16x32xf32>
    %25 = arith.addf %22, %24 : vector<16x32xf32>
    %c0_18 = arith.constant 0 : index
    %c0_19 = arith.constant 0 : index
    %26 = vector.load %arg8[%c0_18, %c0_19] : memref<16x32xf32, #tpu.memory_space<vmem>>, vector<16x32xf32>
    tpu.vector_store %arg8[%c0_18, %c0_19], %25 {strides = array<i32>} : memref<16x32xf32, #tpu.memory_space<vmem>>, vector<16x32xf32>,
    return
  }
  func.func @transform_0(%arg0: i32) -> (i32, i32) {
    %c0_i32 = arith.constant 0 : i32
    %c0_i32_0 = arith.constant 0 : i32
    return %arg0, %c0_i32 : i32, i32
  }
  func.func @transform_1(%arg0: i32) -> (i32, i32) {
    %c0_i32 = arith.constant 0 : i32
    %c0_i32_0 = arith.constant 0 : i32
    %c0_i32_1 = arith.constant 0 : i32
    return %c0_i32, %c0_i32_0 : i32, i32
  }
  func.func @transform_2(%arg0: i32) -> (i32, i32) {
    %c0_i32 = arith.constant 0 : i32
    %c0_i32_0 = arith.constant 0 : i32
    %c0_i32_1 = arith.constant 0 : i32
    return %c0_i32, %c0_i32_0 : i32, i32
  }
  func.func @transform_3(%arg0: i32) -> (i32, i32) {
    %c0_i32 = arith.constant 0 : i32
    %c0_i32_0 = arith.constant 0 : i32
    %c0_i32_1 = arith.constant 0 : i32
    return %c0_i32, %c0_i32_0 : i32, i32
  }
  func.func @transform_4(%arg0: i32) -> (i32, i32) {
    %c0_i32 = arith.constant 0 : i32
    %c0_i32_0 = arith.constant 0 : i32
    %c0_i32_1 = arith.constant 0 : i32
    return %c0_i32, %c0_i32_0 : i32, i32
  }
  func.func @transform_5(%arg0: i32) -> (i32, i32) {
    %c0_i32 = arith.constant 0 : i32
    %c0_i32_0 = arith.constant 0 : i32
    %c0_i32_1 = arith.constant 0 : i32
    return %c0_i32, %c0_i32_0 : i32, i32
  }
  func.func @transform_6(%arg0: i32) -> (i32, i32) {
    %c0_i32 = arith.constant 0 : i32
    %c0_i32_0 = arith.constant 0 : i32
    %c0_i32_1 = arith.constant 0 : i32
    return %c0_i32, %c0_i32_0 : i32, i32
  }
  func.func @transform_7(%arg0: i32) -> (i32, i32) {
    %c0_i32 = arith.constant 0 : i32
    %c0_i32_0 = arith.constant 0 : i32
    return %arg0, %c0_i32 : i32, i32
  }
}

</mosaic_0001>

<bundles_post_ra>
// kernel: tpu_custom_call.1
= control target key start
LH: loop header
LB: loop body
LE: loop exit
PB: predicated region body
PF: predicated region fallthrough
CT: control target
= control target key end

     0   :  { %s521_s0 = inlined_call_operand.vmem [shape: bf16[16,32], index: 0, kind: input, shape index: {}]   ;;  %s522_s1 = inlined_call_operand.vmem [shape: bf16[32,128], index: 1, kind: input, shape index: {}]   ;;  %s523_s2 = inlined_call_operand.vmem [shape: bf16[32,128], index: 2, kind: input, shape index: {}]   ;;  %s524_s3 = inlined_call_operand.vmem [shape: f32[1,128], index: 3, kind: input, shape index: {}]   ;;  %s525_s4 = inlined_call_operand.vmem [shape: f32[1,128], index: 4, kind: input, shape index: {}]   ;;  %s526_s5 = inlined_call_operand.vmem [shape: bf16[128,32], index: 5, kind: input, shape index: {}]   ;;  %s527_s6 = inlined_call_operand.vmem [shape: f32[1,32], index: 6, kind: input, shape index: {}]   ;;  %s528_s7 = inlined_call_operand.hbm [shape: f32[16,32], index: 7, kind: output, shape index: {}]  }
   0x1   :  { %v360_v0 = vld [vmem:[%s523_s2 + $0x8] sm:$0xff]  ;;  %v359_v2 = vld [vmem:[%s523_s2] sm:$0xff] }
   0x2   :  { %v358_v1 = vld [vmem:[%s522_s1 + $0x8] sm:$0xff]  ;;  %99 = vmatpush.bf16.msra.mxu1 %v360_v0  ;;  %v357_v3 = vld [vmem:[%s522_s1] sm:$0xff] }
   0x3   :  { %70 = vmatpush.bf16.msra.mxu0 %v358_v1 }
   0x4   :  { %12 = vsyncpa [#allocation3], 0  ;;  %v356_v4 = vld [vmem:[%s521_s0] sm:$0xff]  ;;  %vm60_vm0 = vcmask 261120   ;;  %v368_v9 = vld [vmem:[%s526_s5 + $0x38] sm:$0xff]  ;;  %s288_s8 = sshll.u32 %s528_s7, 4  ;;  %s289_s8 = int_to_ptr.hbm [resolvable:$true] %s288_s8 }
   0x5   :  { %v372_v5 = vld [vmem:[%s525_s4] ss:$0 sm:$0xff]  ;;  %266 = vmatpush.bf16.msra.mxu2 %v368_v9  ;;  %v367_v12 = vld [vmem:[%s526_s5 + $0x30] sm:$0xff]  ;;  %v366_v19 = vld [vmem:[%s526_s5 + $0x28] sm:$0xff]  ;;  %s406_s9 = smov 128   ;;  %s407_s10 = smov 8  }
   0x6   :  { %100 = vmatpush.bf16.msra.mxu1 %v359_v2  ;;  %v365_v25 = vld [vmem:[%s526_s5 + $0x20] sm:$0xff]  ;;  %v364_v32 = vld [vmem:[%s526_s5 + $0x18] sm:$0xff]  ;;  %v363_v40 = vld [vmem:[%s526_s5 + $0x10] sm:$0xff] }
   0x7   :  { %71 = vmatpush.bf16.msra.mxu0 %v357_v3  ;;  %v362_v47 = vld [vmem:[%s526_s5 + $0x8] sm:$0xff]  ;;  %v361_v52 = vld [vmem:[%s526_s5] sm:$0xff] }
   0x9   :  { %321 = vmatmul.msk.bf16.vlgmr.msra.gmra.mxu1 %vm60_vm0, %v356_v4  ;;  %267 = vmatpush.bf16.msra.mxu2 %v367_v12 }
   0xa   :  { %312 = vmatmul.msk.bf16.vlgmr.msra.gmra.mxu0 %vm60_vm0, %v356_v4 }
   0xd   :  { %268 = vmatpush.bf16.msra.mxu2 %v366_v19 }
  0x11   :  { %269 = vmatpush.bf16.msra.mxu2 %v365_v25 }
  0x15   :  { %270 = vmatpush.bf16.msra.mxu2 %v364_v32 }
  0x19   :  { %271 = vmatpush.bf16.msra.mxu2 %v363_v40 }
  0x1d   :  { %272 = vmatpush.bf16.msra.mxu2 %v362_v47 }
  0x21   :  { %273 = vmatpush.bf16.msra.mxu2 %v361_v52 }
  0x86   :  { %v102_v6 = vpop.f32.mrf.mxu1 }
  0x87   :  { %v468_v7 = vadd.f32 %v372_v5, %v102_v6 }
  0x89   :  { %v471_v8 = vmul.f32 0.70710677, %v468_v7 }
  0x8b   :  { %v111_v10 = vmul.f32 %v471_v8, %v471_v8 }
  0x8d   :  { %v112_v11 = vmin.f32 %v111_v10, 16.0 }
  0x8e   :  { %v104_v13 = vpop.f32.mrf.mxu1 }
  0x8f   :  { %v113_v14 = vmul.f32 2.1237322e-06, %v112_v11  ;;  %v124_v15 = vmul.f32 3.8918573e-05, %v112_v11  ;;  %v481_v16 = vadd.f32 %v372_v5, %v104_v13 }
  0x91   :  { %v114_v17 = vadd.f32 0.00028619796, %v113_v14  ;;  %v125_v18 = vadd.f32 0.001143296, %v124_v15  ;;  %v487_v20 = vmul.f32 0.70710677, %v481_v16 }
  0x93   :  { %v115_v21 = vmul.f32 %v114_v17, %v112_v11  ;;  %v126_v22 = vmul.f32 %v125_v18, %v112_v11  ;;  %v151_v23 = vmul.f32 %v487_v20, %v487_v20  ;;  %v73_v18 = vpop.f32.mrf.mxu0 }
  0x95   :  { %v127_v24 = vadd.f32 0.014752088, %v126_v22  ;;  %v152_v26 = vmin.f32 %v151_v23, 16.0  ;;  %v116_v27 = vadd.f32 0.0036580483, %v115_v21 }
  0x97   :  { %v128_v28 = vmul.f32 %v127_v24, %v112_v11  ;;  %v153_v29 = vmul.f32 2.1237322e-06, %v152_v26  ;;  %v164_v30 = vmul.f32 3.8918573e-05, %v152_v26  ;;  %v117_v35 = vmul.f32 %v116_v27, %v112_v11 }
  0x99   :  { %v129_v31 = vadd.f32 0.112945676, %v128_v28  ;;  %v154_v33 = vadd.f32 0.00028619796, %v153_v29  ;;  %v165_v34 = vadd.f32 0.001143296, %v164_v30 }
  0x9a   :  { %v118_v42 = vadd.f32 0.05243302, %v117_v35  ;;  %v373_v29 = vld [vmem:[%s524_s3] ss:$0 sm:$0xff]  ;;  %s405_s3 = smov [#allocation2]  }
  0x9b   :  { %v130_v36 = vmul.f32 %v129_v31, %v112_v11  ;;  %v155_v37 = vmul.f32 %v154_v33, %v152_v26  ;;  %v166_v38 = vmul.f32 %v165_v34, %v152_v26  ;;  %v107_v31 = vmul.f32 0.5, %v468_v7  ;;  %v75_v33 = vpop.f32.mrf.mxu0  ;;  %s286_s28 = sshll.u32 %s405_s3, 4  ;;  %s287_s28 = int_to_ptr.vmem [resolvable:$true] %s286_s28 }
  0x9c   :  { %v119_v49 = vmul.f32 %v118_v42, %v112_v11  ;;  %v108_v34 = vmul.f32 0.5, %v481_v16  ;;  %v74_v35 = vadd.f32 %v373_v29, %v73_v18  ;;  %v374_v42 = vld [vmem:[%s527_s6] ss:$0 sm:$0xff] }
  0x9d   :  { %v131_v39 = vadd.f32 0.4994258, %v130_v36  ;;  %v167_v41 = vadd.f32 0.014752088, %v166_v38  ;;  %v156_v44 = vadd.f32 0.0036580483, %v155_v37  ;;  %v76_v38 = vadd.f32 %v373_v29, %v75_v33 }
  0x9e   :  { %v120_v54 = vadd.f32 0.18741608, %v119_v49 }
  0x9f   :  { %v132_v43 = vmul.f32 %v131_v39, %v112_v11  ;;  %v168_v45 = vmul.f32 %v167_v41, %v152_v26  ;;  %v157_v50 = vmul.f32 %v156_v44, %v152_v26 }
  0xa0   :  { %v121_v60 = vmul.f32 %v120_v54, %v112_v11 }
  0xa1   :  { %v133_v46 = vadd.f32 1.0, %v132_v43  ;;  %v169_v48 = vadd.f32 0.112945676, %v168_v45  ;;  %v158_v55 = vadd.f32 0.05243302, %v157_v50 }
  0xa2   :  { %v122_v2 = vadd.f32 1.1283791, %v121_v60 }
  0xa3   :  { %375 = vrcp.f32 %v133_v46  ;;  %v170_v51 = vmul.f32 %v169_v48, %v152_v26  ;;  %v159_v61 = vmul.f32 %v158_v55, %v152_v26  ;;  %v145_v63 = vand.u32 2147483648, %v133_v46 }
  0xa4   :  { %v143_v1 = vand.u32 2147483647, %v133_v46  ;;  %vm139_vm2 = vweird.f32 %v133_v46  ;;  %v123_v10 = vmul.f32 %v122_v2, %v471_v8 }
  0xa5   :  { %v171_v53 = vadd.f32 0.4994258, %v170_v51  ;;  %v160_v3 = vadd.f32 0.18741608, %v159_v61  ;;  %v146_v5 = vor.u32 1.1754944e-38, %v145_v63 }
  0xa6   :  { %vm144_vm4 = vcmp.eq.f32.partialorder %v143_v1, 8.507059e+37 }
  0xa7   :  { %v172_v56 = vmul.f32 %v171_v53, %v152_v26  ;;  %v161_v11 = vmul.f32 %v160_v3, %v152_v26 }
  0xa9   :  { %v376_v57 = vpop.eup %375  ;;  %v173_v59 = vadd.f32 1.0, %v172_v56  ;;  %v162_v19 = vadd.f32 1.1283791, %v161_v11 }
  0xaa   :  { %v135_v58 = vmul.f32 %v376_v57, %v133_v46  ;;  %vm140_vm1 = vweird.f32 %v376_v57 }
  0xab   :  { %377 = vrcp.f32 %v173_v59  ;;  %vm141_vm3 = vmor %vm139_vm2, %vm140_vm1  ;;  %v185_v17 = vand.u32 2147483648, %v173_v59  ;;  %v183_v22 = vand.u32 2147483647, %v173_v59  ;;  %vm179_vm6 = vweird.f32 %v173_v59 }
  0xac   :  { %v136_v62 = vsub.f32 1.0, %v135_v58  ;;  %v163_v27 = vmul.f32 %v162_v19, %v487_v20 }
  0xad   :  { %v186_v25 = vor.u32 1.1754944e-38, %v185_v17  ;;  %vm184_vm8 = vcmp.eq.f32.partialorder %v183_v22, 8.507059e+37 }
  0xae   :  { %v137_v0 = vmul.f32 %v376_v57, %v136_v62 }
  0xb0   :  { %v138_v4 = vadd.f32 %v376_v57, %v137_v0 }
  0xb1   :  { %v378_v6 = vpop.eup %377 }
  0xb2   :  { %v142_v9 = vsel %vm141_vm3, %v376_v57, %v138_v4  ;;  %v175_v13 = vmul.f32 %v378_v6, %v173_v59  ;;  %vm180_vm5 = vweird.f32 %v378_v6 }
  0xb3   :  { %v147_v12 = vsel %vm144_vm4, %v146_v5, %v142_v9  ;;  %vm181_vm7 = vmor %vm179_vm6, %vm180_vm5 }
  0xb4   :  { %v148_v14 = vmul.f32 %v147_v12, %v123_v10  ;;  %v176_v15 = vsub.f32 1.0, %v175_v13 }
  0xb6   :  { %v177_v21 = vmul.f32 %v378_v6, %v176_v15  ;;  %v322_v24 = vclamps-f32 %v148_v14, 1.0 }
  0xb8   :  { %v178_v23 = vadd.f32 %v378_v6, %v177_v21  ;;  %v191_v30 = vadd.f32 1.0, %v322_v24 }
  0xba   :  { %v182_v28 = vsel %vm181_vm7, %v378_v6, %v178_v23  ;;  %v193_v36 = vmul.f32 %v191_v30, %v107_v31 }
  0xbb   :  { %v187_v8 = vsel %vm184_vm8, %v186_v25, %v182_v28 }
  0xbc   :  { %v188_v26 = vmul.f32 %v187_v8, %v163_v27  ;;  %v195_v39 = vmul.f32 %v193_v36, %v74_v35 }
  0xbe   :  { %v323_v32 = vclamps-f32 %v188_v26, 1.0 }
  0xc0   :  { %v192_v37 = vadd.f32 1.0, %v323_v32 }
  0xc2   :  { %v194_v20 = vmul.f32 %v192_v37, %v108_v34 }
  0xc4   :  { %v196_v40 = vmul.f32 %v194_v20, %v76_v38 }
  0xc6   :  { %v197_v41 = vpack.c.bf16 %v196_v40, %v195_v39 }
  0xc8   :  { %274 = vmatmul.bf16.vlgmr.msra.gmra.mxu2 %v197_v41 }
 0x14b   :  { %v275_v43 = vpop.f32.mrf.mxu2 }
 0x14c   :  { %v276_v44 = vadd.f32 %v374_v42, %v275_v43 }
 0x14e   :  { %280 = vst.msk [vmem:[#allocation2] sm:$0xff] %vm60_vm0, %v276_v44 }
 0x153   :  { %v277_v7 = vpop.f32.mrf.mxu2 }
 0x154   :  { %v278_v16 = vadd.f32 %v374_v42, %v277_v7 }
 0x156   :  { %281 = vst.msk [vmem:[#allocation2 + $0x8] sm:$0xff] %vm60_vm0, %v278_v16 }
 0x157   :  { %294 = dma.vmem_to_hbm [thread:$0]  %s287_s28, 256, %s289_s8, [#allocation3], %s406_s9, %s406_s9, %s407_s10  }
 0x158   :  { %403 = dma.done.wait [#allocation3], 256  }
 0x159   :  { %404 = vsyncadd [#allocation3], 4294967040 }
 0x15a   :  { %299 = vsyncpa [#allocation3], 1 }

</bundles_post_ra>
